<compile_context>
chip_gen: v6e
topology: v6e:2x2x1
jax: 0.10.0
libtpu: 0.0.40
codegen_flags: <defaults>
</compile_context>

<pallas_src>
import functools

import jax
import jax.numpy as jnp
from jax.experimental import pallas as pl
from jax.experimental.pallas import tpu as pltpu

_LANE = 128      # last dim of every block must be a multiple of this
_SUBLANE = 8     # second-to-last dim granularity
_MIB = 1024 * 1024


def _round_up(x: int, m: int) -> int:
    return (x + m - 1) // m * m


def _vmem_capacity_bytes() -> int:
    """Physical VMEM of the local chip; conservative default if query fails."""
    try:
        return int(pltpu.get_tpu_info().vmem_capacity_bytes)
    except Exception:
        return 64 * _MIB        # v7x per-TensorCore VMEM (the tightest generation)


# --------------------------------------------------------------------------- #
# One-time parameter preparation (hoisted out of the per-call path)           #
# --------------------------------------------------------------------------- #
def prepare_mlp_params(params, *, weight_dtype=jnp.bfloat16):
    """Pad every feature dim to a lane multiple and cast weights to `weight_dtype`.

    params: [(W (in, out), b (out,) or (1, out)), ...]  with W = W_pytorch.T
    Returns (dims, dims_pad, padded_params); biases stay f32 (added after the
    f32-accumulated matmul), weights are `weight_dtype` (bf16 by default).
    """
    dims = [params[0][0].shape[0]] + [w.shape[1] for (w, _) in params]
    dims_pad = [_round_up(d, _LANE) for d in dims]

    padded = []
    for i, (w, b) in enumerate(params):
        din, dout = w.shape
        w_p = (jnp.zeros((dims_pad[i], dims_pad[i + 1]), jnp.float32)
               .at[:din, :dout].set(jnp.asarray(w, jnp.float32))).astype(weight_dtype)
        b_p = (jnp.zeros((1, dims_pad[i + 1]), jnp.float32)
               .at[:, :dout].set(jnp.asarray(b, jnp.float32).reshape(1, -1)))
        padded.append((w_p, b_p))
    return dims, dims_pad, padded


# --------------------------------------------------------------------------- #
# Kernel 1: whole MLP fused, weights resident in VMEM                         #
# --------------------------------------------------------------------------- #
def _fused_mlp_kernel(x_ref, *refs, n_layers: int):
    """refs = (w0, b0, ..., w_{L-1}, b_{L-1}, o_ref). One batch tile per grid step."""
    o_ref = refs[-1]
    h = x_ref[...].astype(jnp.float32)
    for i in range(n_layers):
        w = refs[2 * i][...]                       # bf16 (or f32) padded weight
        b = refs[2 * i + 1][...]                   # f32 (1, Dout) bias
        h = jnp.dot(h.astype(w.dtype), w, preferred_element_type=jnp.float32) + b
        if i < n_layers - 1:                       # ReLU on all but the last layer
            h = jnp.maximum(h, 0.0)
    o_ref[...] = h.astype(o_ref.dtype)


# --------------------------------------------------------------------------- #
# Kernel 2: per-layer fallback (weight streamed over K/N tiles)               #
# --------------------------------------------------------------------------- #
def _linear_kernel(x_ref, w_ref, b_ref, o_ref, acc_ref, *, apply_relu: bool):
    k = pl.program_id(2)

    @pl.when(k == 0)
    def _():
        acc_ref[...] = jnp.zeros_like(acc_ref)

    acc_ref[...] += jnp.dot(x_ref[...].astype(w_ref.dtype), w_ref[...],
                            preferred_element_type=jnp.float32)

    @pl.when(k == pl.num_programs(2) - 1)
    def _():
        y = acc_ref[...] + b_ref[...]
        if apply_relu:
            y = jnp.maximum(y, 0.0)
        o_ref[...] = y.astype(o_ref.dtype)


def _linear_pallas(h, w_p, b_p, *, apply_relu, tile_m, out_dtype, vmem_limit):
    m, kdim = h.shape
    _, ndim = w_p.shape
    tm = min(tile_m, m)
    tn = 256 if ndim % 256 == 0 else 128
    tk = 512 if kdim % 512 == 0 else (256 if kdim % 256 == 0 else 128)
    grid = (m // tm, ndim // tn, kdim // tk)

    kernel = functools.partial(_linear_kernel, apply_relu=apply_relu)
    return pl.pallas_call(
        kernel,
        out_shape=jax.ShapeDtypeStruct((m, ndim), out_dtype),
        grid=grid,
        in_specs=[pl.BlockSpec((tm, tk), lambda i, j, k: (i, k)),
                  pl.BlockSpec((tk, tn), lambda i, j, k: (k, j)),
                  pl.BlockSpec((1, tn), lambda i, j, k: (0, j))],
        out_specs=pl.BlockSpec((tm, tn), lambda i, j, k: (i, j)),
        scratch_shapes=[pltpu.VMEM((tm, tn), jnp.float32)],
        compiler_params=pltpu.CompilerParams(
            dimension_semantics=("parallel", "parallel", "arbitrary"),
            vmem_limit_bytes=vmem_limit),
    )(h, w_p, b_p)


# --------------------------------------------------------------------------- #
# Forward pass                                                                #
# --------------------------------------------------------------------------- #
def mlp_forward(x, prepared, *, tile_b_cap=None, out_dtype=None):
    """Run the MLP. `prepared` comes from prepare_mlp_params (one-time)."""
    dims, dims_pad, padded_params = prepared
    batch, n_in = x.shape
    assert n_in == dims[0], "input feature dim mismatch"
    n_layers = len(padded_params)
    out_dtype = out_dtype or x.dtype
    out_isize = jnp.dtype(out_dtype).itemsize

    vmem_cap = _vmem_capacity_bytes()
    budget = int(0.75 * vmem_cap)                 # ~48 MiB on v7x, ~96 MiB on v5e/v6e
    if tile_b_cap is None:
        tile_b_cap = 512 if vmem_cap >= 96 * _MIB else 256

    # ---- batch tiling: >= 2 grid steps for megacore once batch > 16, small
    #      padding waste otherwise ----
    if batch <= 2 * _SUBLANE:
        tile_b = _round_up(max(batch, 1), _SUBLANE)
    else:
        tile_b = min(tile_b_cap, _round_up(pl.cdiv(batch, 2), _SUBLANE))
    batch_pad = _round_up(batch, tile_b)
    grid = (batch_pad // tile_b,)

    # ---- per-call padding of x only (weights were prepared once) ----
    x_p = (jnp.zeros((batch_pad, dims_pad[0]), jnp.float32)
           .at[:batch, :n_in].set(x.astype(jnp.float32)))

    weight_bytes = sum(int(w.size) * w.dtype.itemsize + int(b.size) * b.dtype.itemsize
                       for (w, b) in padded_params)

    # ---- resident-path VMEM estimate (single-buffered weights) ----
    resident = (weight_bytes
                + 2 * 4 * tile_b * dims_pad[0]            # double-buffered x tile
                + 2 * out_isize * tile_b * dims_pad[-1]   # double-buffered out tile
                + 4 * tile_b * max(dims_pad))             # widest live activation
    use_resident = resident + 8 * _MIB <= budget

    if not use_resident:
        # Weight-streaming fallback: per-layer fused matmul+bias(+ReLU) kernels.
        h = x_p
        for li, (w_p, b_p) in enumerate(padded_params):
            last = li == n_layers - 1
            h = _linear_pallas(h, w_p, b_p, apply_relu=not last, tile_m=tile_b,
                               out_dtype=(out_dtype if last else jnp.float32),
                               vmem_limit=budget)
        return h[:batch, :dims[-1]]

    # ---- fully fused, weight-resident path ----
    flat_inputs = [x_p]
    for w_p, b_p in padded_params:
        flat_inputs.extend([w_p, b_p])

    flops = sum(2 * batch_pad * dims_pad[i] * dims_pad[i + 1] for i in range(n_layers))
    bytes_accessed = (4 * batch_pad * dims_pad[0]
                      + out_isize * batch_pad * dims_pad[-1]
                      + weight_bytes)
    cost = pl.CostEstimate(flops=flops, transcendentals=0,
                           bytes_accessed=bytes_accessed)
    kernel = functools.partial(_fused_mlp_kernel, n_layers=n_layers)

    def _resident_call(single_buffer_weights: bool):
        wb_kwargs = ({"pipeline_mode": pl.Buffered(1)}
                     if single_buffer_weights else {})
        in_specs = [pl.BlockSpec((tile_b, dims_pad[0]), lambda i: (i, 0))]
        for li in range(n_layers):
            din_p, dout_p = dims_pad[li], dims_pad[li + 1]
            in_specs.append(pl.BlockSpec((din_p, dout_p), lambda i: (0, 0),
                                         **wb_kwargs))
            in_specs.append(pl.BlockSpec((1, dout_p), lambda i: (0, 0),
                                         **wb_kwargs))
        out_spec = pl.BlockSpec((tile_b, dims_pad[-1]), lambda i: (i, 0))

        wmult = 1 if single_buffer_weights else 2
        res = resident + (wmult - 1) * weight_bytes
        vmem_limit = min(max(res + 16 * _MIB, 32 * _MIB), budget)

        return pl.pallas_call(
            kernel,
            out_shape=jax.ShapeDtypeStruct((batch_pad, dims_pad[-1]), out_dtype),
            grid=grid,
            in_specs=in_specs,
            out_specs=out_spec,
            compiler_params=pltpu.CompilerParams(
                dimension_semantics=("parallel",),    # v7x: both TCs split batch tiles
                vmem_limit_bytes=vmem_limit),
            cost_estimate=cost,
        )(*flat_inputs)

    try:
        out_p = _resident_call(True)          # single-buffered grid-invariant weights
    except Exception:
        out_p = _resident_call(False)         # graceful retry without pl.Buffered(1)

    return out_p[:batch, :dims[-1]]


# --------------------------------------------------------------------------- #
# Init + reference (mirrors the PyTorch module)                               #
# --------------------------------------------------------------------------- #
def init_mlp_params(key, n_in, hidden_layers, n_out):
    """xavier_uniform weights + 0.01 bias, mirroring the PyTorch init."""
    layers_in = [n_in] + list(hidden_layers)
    layers_out = list(hidden_layers) + [n_out]
    params = []
    for fan_in, fan_out in zip(layers_in, layers_out):
        key, sub = jax.random.split(key)
        limit = (6.0 / (fan_in + fan_out)) ** 0.5
        w = jax.random.uniform(sub, (fan_in, fan_out), jnp.float32, -limit, limit)
        b = jnp.full((1, fan_out), 0.01, jnp.float32)
        params.append((w, b))
    return params


def mlp_reference(x, params, *, matmul_dtype=jnp.float32):
    n_layers = len(params)
    h = x.astype(jnp.float32)
    for i, (w, b) in enumerate(params):
        h = jnp.dot(h.astype(matmul_dtype), w.astype(matmul_dtype),
                    preferred_element_type=jnp.float32) + b.reshape(1, -1)
        if i < n_layers - 1:
            h = jnp.maximum(h, 0.0)
    return h


if __name__ == "__main__":
    key = jax.random.PRNGKey(0)
    k_x, k_p = jax.random.split(key)

    batch = 8
    n_in = 32
    hidden_layers = [64, 32]
    n_out = 16

    x = jax.random.normal(k_x, (batch, n_in), jnp.float32)
    params = init_mlp_params(k_p, n_in, hidden_layers, n_out)
    prepared = prepare_mlp_params(params)          # one-time pad + bf16 cast

    out = jax.block_until_ready(mlp_forward(x, prepared))
    assert out.shape == (batch, n_out)

    # Tight check vs a reference that emulates the kernel's bf16-matmul math.
    ref_bf16 = mlp_reference(x, params, matmul_dtype=jnp.bfloat16)
    assert jnp.allclose(out, ref_bf16, atol=5e-3, rtol=5e-3), \
        f"max abs err vs bf16 ref: {float(jnp.max(jnp.abs(out - ref_bf16)))}"

    # Loose sanity check vs the full-f32 reference (bf16 rounding only).
    ref_f32 = mlp_reference(x, params, matmul_dtype=jnp.float32)
    assert jnp.allclose(out, ref_f32, atol=5e-2, rtol=5e-2), \
        f"max abs err vs f32 ref: {float(jnp.max(jnp.abs(out - ref_f32)))}"

    print("KERNEL_OK")
</pallas_src>

<mosaic_0001>
module attributes {stable_mosaic.version = 11 : i64} {
  func.func @_fused_mlp_kernel(%arg0: i32, %arg1: memref<8x128xf32, #tpu.memory_space<vmem>>, %arg2: memref<128x128xbf16, #tpu.memory_space<vmem>>, %arg3: memref<1x128xf32, #tpu.memory_space<vmem>>, %arg4: memref<128x128xbf16, #tpu.memory_space<vmem>>, %arg5: memref<1x128xf32, #tpu.memory_space<vmem>>, %arg6: memref<128x128xbf16, #tpu.memory_space<vmem>>, %arg7: memref<1x128xf32, #tpu.memory_space<vmem>>, %arg8: memref<8x128xf32, #tpu.memory_space<vmem>>) attributes {dimension_semantics = [#tpu.dimension_semantics<parallel>], iteration_bounds = array<i64: 1>, scalar_prefetch = 0 : i64, scratch_operands = 0 : i64, tpu.core_type = #tpu.core_type<tc>, window_params = [{transform_indices = @transform_0, window_bounds = array<i64: 8, 128>}, {pipeline_mode = #tpu.pipeline_mode<synchronous>, transform_indices = @transform_1, window_bounds = array<i64: 128, 128>}, {pipeline_mode = #tpu.pipeline_mode<synchronous>, transform_indices = @transform_2, window_bounds = array<i64: 1, 128>}, {pipeline_mode = #tpu.pipeline_mode<synchronous>, transform_indices = @transform_3, window_bounds = array<i64: 128, 128>}, {pipeline_mode = #tpu.pipeline_mode<synchronous>, transform_indices = @transform_4, window_bounds = array<i64: 1, 128>}, {pipeline_mode = #tpu.pipeline_mode<synchronous>, transform_indices = @transform_5, window_bounds = array<i64: 128, 128>}, {pipeline_mode = #tpu.pipeline_mode<synchronous>, transform_indices = @transform_6, window_bounds = array<i64: 1, 128>}, {transform_indices = @transform_7, window_bounds = array<i64: 8, 128>}]} {
    %c0 = arith.constant 0 : index
    %c0_0 = arith.constant 0 : index
    %0 = vector.load %arg1[%c0, %c0_0] : memref<8x128xf32, #tpu.memory_space<vmem>>, vector<8x128xf32>
    %c0_1 = arith.constant 0 : index
    %c0_2 = arith.constant 0 : index
    %1 = vector.load %arg2[%c0_1, %c0_2] : memref<128x128xbf16, #tpu.memory_space<vmem>>, vector<128x128xbf16>
    %c0_3 = arith.constant 0 : index
    %c0_4 = arith.constant 0 : index
    %2 = vector.load %arg3[%c0_3, %c0_4] : memref<1x128xf32, #tpu.memory_space<vmem>>, vector<1x128xf32>
    %3 = arith.truncf %0 : vector<8x128xf32> to vector<8x128xbf16>
    %cst = arith.constant dense<0.000000e+00> : vector<8x128xf32>
    %4 = tpu.matmul %3, %1, %cst {dimension_numbers = #tpu.dot_dimension_numbers<[1], [0], [0], [1], [0, 0, 1, 1], [], []>} : vector<8x128xbf16>, vector<128x128xbf16>, vector<8x128xf32> -> vector<8x128xf32>
    %5 = vector.broadcast %2 : vector<1x128xf32> to vector<8x128xf32>
    %6 = arith.addf %4, %5 : vector<8x128xf32>
    %cst_5 = arith.constant 0.000000e+00 : f32
    %7 = vector.broadcast %cst_5 : f32 to vector<8x128xf32>
    %8 = arith.maximumf %6, %7 : vector<8x128xf32>
    %c0_6 = arith.constant 0 : index
    %c0_7 = arith.constant 0 : index
    %9 = vector.load %arg4[%c0_6, %c0_7] : memref<128x128xbf16, #tpu.memory_space<vmem>>, vector<128x128xbf16>
    %c0_8 = arith.constant 0 : index
    %c0_9 = arith.constant 0 : index
    %10 = vector.load %arg5[%c0_8, %c0_9] : memref<1x128xf32, #tpu.memory_space<vmem>>, vector<1x128xf32>
    %11 = arith.truncf %8 : vector<8x128xf32> to vector<8x128xbf16>
    %cst_10 = arith.constant dense<0.000000e+00> : vector<8x128xf32>
    %12 = tpu.matmul %11, %9, %cst_10 {dimension_numbers = #tpu.dot_dimension_numbers<[1], [0], [0], [1], [0, 0, 1, 1], [], []>} : vector<8x128xbf16>, vector<128x128xbf16>, vector<8x128xf32> -> vector<8x128xf32>
    %13 = vector.broadcast %10 : vector<1x128xf32> to vector<8x128xf32>
    %14 = arith.addf %12, %13 : vector<8x128xf32>
    %cst_11 = arith.constant 0.000000e+00 : f32
    %15 = vector.broadcast %cst_11 : f32 to vector<8x128xf32>
    %16 = arith.maximumf %14, %15 : vector<8x128xf32>
    %c0_12 = arith.constant 0 : index
    %c0_13 = arith.constant 0 : index
    %17 = vector.load %arg6[%c0_12, %c0_13] : memref<128x128xbf16, #tpu.memory_space<vmem>>, vector<128x128xbf16>
    %c0_14 = arith.constant 0 : index
    %c0_15 = arith.constant 0 : index
    %18 = vector.load %arg7[%c0_14, %c0_15] : memref<1x128xf32, #tpu.memory_space<vmem>>, vector<1x128xf32>
    %19 = arith.truncf %16 : vector<8x128xf32> to vector<8x128xbf16>
    %cst_16 = arith.constant dense<0.000000e+00> : vector<8x128xf32>
    %20 = tpu.matmul %19, %17, %cst_16 {dimension_numbers = #tpu.dot_dimension_numbers<[1], [0], [0], [1], [0, 0, 1, 1], [], []>} : vector<8x128xbf16>, vector<128x128xbf16>, vector<8x128xf32> -> vector<8x128xf32>
    %21 = vector.broadcast %18 : vector<1x128xf32> to vector<8x128xf32>
    %22 = arith.addf %20, %21 : vector<8x128xf32>
    %c0_17 = arith.constant 0 : index
    %c0_18 = arith.constant 0 : index
    %23 = vector.load %arg8[%c0_17, %c0_18] : memref<8x128xf32, #tpu.memory_space<vmem>>, vector<8x128xf32>
    tpu.vector_store %arg8[%c0_17, %c0_18], %22 {strides = array<i32>} : memref<8x128xf32, #tpu.memory_space<vmem>>, vector<8x128xf32>,
    return
  }
  func.func @transform_0(%arg0: i32) -> (i32, i32) {
    %c0_i32 = arith.constant 0 : i32
    %c0_i32_0 = arith.constant 0 : i32
    return %arg0, %c0_i32 : i32, i32
  }
  func.func @transform_1(%arg0: i32) -> (i32, i32) {
    %c0_i32 = arith.constant 0 : i32
    %c0_i32_0 = arith.constant 0 : i32
    %c0_i32_1 = arith.constant 0 : i32
    return %c0_i32, %c0_i32_0 : i32, i32
  }
  func.func @transform_2(%arg0: i32) -> (i32, i32) {
    %c0_i32 = arith.constant 0 : i32
    %c0_i32_0 = arith.constant 0 : i32
    %c0_i32_1 = arith.constant 0 : i32
    return %c0_i32, %c0_i32_0 : i32, i32
  }
  func.func @transform_3(%arg0: i32) -> (i32, i32) {
    %c0_i32 = arith.constant 0 : i32
    %c0_i32_0 = arith.constant 0 : i32
    %c0_i32_1 = arith.constant 0 : i32
    return %c0_i32, %c0_i32_0 : i32, i32
  }
  func.func @transform_4(%arg0: i32) -> (i32, i32) {
    %c0_i32 = arith.constant 0 : i32
    %c0_i32_0 = arith.constant 0 : i32
    %c0_i32_1 = arith.constant 0 : i32
    return %c0_i32, %c0_i32_0 : i32, i32
  }
  func.func @transform_5(%arg0: i32) -> (i32, i32) {
    %c0_i32 = arith.constant 0 : i32
    %c0_i32_0 = arith.constant 0 : i32
    %c0_i32_1 = arith.constant 0 : i32
    return %c0_i32, %c0_i32_0 : i32, i32
  }
  func.func @transform_6(%arg0: i32) -> (i32, i32) {
    %c0_i32 = arith.constant 0 : i32
    %c0_i32_0 = arith.constant 0 : i32
    %c0_i32_1 = arith.constant 0 : i32
    return %c0_i32, %c0_i32_0 : i32, i32
  }
  func.func @transform_7(%arg0: i32) -> (i32, i32) {
    %c0_i32 = arith.constant 0 : i32
    %c0_i32_0 = arith.constant 0 : i32
    return %arg0, %c0_i32 : i32, i32
  }
}

module attributes {stable_mosaic.version = 11 : i64} {
  func.func @_fused_mlp_kernel(%arg0: i32, %arg1: memref<8x128xf32, #tpu.memory_space<vmem>>, %arg2: memref<128x128xbf16, #tpu.memory_space<vmem>>, %arg3: memref<1x128xf32, #tpu.memory_space<vmem>>, %arg4: memref<128x128xbf16, #tpu.memory_space<vmem>>, %arg5: memref<1x128xf32, #tpu.memory_space<vmem>>, %arg6: memref<128x128xbf16, #tpu.memory_space<vmem>>, %arg7: memref<1x128xf32, #tpu.memory_space<vmem>>, %arg8: memref<8x128xf32, #tpu.memory_space<vmem>>) attributes {dimension_semantics = [#tpu.dimension_semantics<parallel>], iteration_bounds = array<i64: 1>, scalar_prefetch = 0 : i64, scratch_operands = 0 : i64, tpu.core_type = #tpu.core_type<tc>, window_params = [{transform_indices = @transform_0, window_bounds = array<i64: 8, 128>}, {pipeline_mode = #tpu.pipeline_mode<synchronous>, transform_indices = @transform_1, window_bounds = array<i64: 128, 128>}, {pipeline_mode = #tpu.pipeline_mode<synchronous>, transform_indices = @transform_2, window_bounds = array<i64: 1, 128>}, {pipeline_mode = #tpu.pipeline_mode<synchronous>, transform_indices = @transform_3, window_bounds = array<i64: 128, 128>}, {pipeline_mode = #tpu.pipeline_mode<synchronous>, transform_indices = @transform_4, window_bounds = array<i64: 1, 128>}, {pipeline_mode = #tpu.pipeline_mode<synchronous>, transform_indices = @transform_5, window_bounds = array<i64: 128, 128>}, {pipeline_mode = #tpu.pipeline_mode<synchronous>, transform_indices = @transform_6, window_bounds = array<i64: 1, 128>}, {transform_indices = @transform_7, window_bounds = array<i64: 8, 128>}]} {
    %c0 = arith.constant 0 : index
    %c0_0 = arith.constant 0 : index
    %0 = vector.load %arg1[%c0, %c0_0] : memref<8x128xf32, #tpu.memory_space<vmem>>, vector<8x128xf32>
    %c0_1 = arith.constant 0 : index
    %c0_2 = arith.constant 0 : index
    %1 = vector.load %arg2[%c0_1, %c0_2] : memref<128x128xbf16, #tpu.memory_space<vmem>>, vector<128x128xbf16>
    %c0_3 = arith.constant 0 : index
    %c0_4 = arith.constant 0 : index
    %2 = vector.load %arg3[%c0_3, %c0_4] : memref<1x128xf32, #tpu.memory_space<vmem>>, vector<1x128xf32>
    %3 = arith.truncf %0 : vector<8x128xf32> to vector<8x128xbf16>
    %cst = arith.constant dense<0.000000e+00> : vector<8x128xf32>
    %4 = tpu.matmul %3, %1, %cst {dimension_numbers = #tpu.dot_dimension_numbers<[1], [0], [0], [1], [0, 0, 1, 1], [], []>} : vector<8x128xbf16>, vector<128x128xbf16>, vector<8x128xf32> -> vector<8x128xf32>
    %5 = vector.broadcast %2 : vector<1x128xf32> to vector<8x128xf32>
    %6 = arith.addf %4, %5 : vector<8x128xf32>
    %cst_5 = arith.constant 0.000000e+00 : f32
    %7 = vector.broadcast %cst_5 : f32 to vector<8x128xf32>
    %8 = arith.maximumf %6, %7 : vector<8x128xf32>
    %c0_6 = arith.constant 0 : index
    %c0_7 = arith.constant 0 : index
    %9 = vector.load %arg4[%c0_6, %c0_7] : memref<128x128xbf16, #tpu.memory_space<vmem>>, vector<128x128xbf16>
    %c0_8 = arith.constant 0 : index
    %c0_9 = arith.constant 0 : index
    %10 = vector.load %arg5[%c0_8, %c0_9] : memref<1x128xf32, #tpu.memory_space<vmem>>, vector<1x128xf32>
    %11 = arith.truncf %8 : vector<8x128xf32> to vector<8x128xbf16>
    %cst_10 = arith.constant dense<0.000000e+00> : vector<8x128xf32>
    %12 = tpu.matmul %11, %9, %cst_10 {dimension_numbers = #tpu.dot_dimension_numbers<[1], [0], [0], [1], [0, 0, 1, 1], [], []>} : vector<8x128xbf16>, vector<128x128xbf16>, vector<8x128xf32> -> vector<8x128xf32>
    %13 = vector.broadcast %10 : vector<1x128xf32> to vector<8x128xf32>
    %14 = arith.addf %12, %13 : vector<8x128xf32>
    %cst_11 = arith.constant 0.000000e+00 : f32
    %15 = vector.broadcast %cst_11 : f32 to vector<8x128xf32>
    %16 = arith.maximumf %14, %15 : vector<8x128xf32>
    %c0_12 = arith.constant 0 : index
    %c0_13 = arith.constant 0 : index
    %17 = vector.load %arg6[%c0_12, %c0_13] : memref<128x128xbf16, #tpu.memory_space<vmem>>, vector<128x128xbf16>
    %c0_14 = arith.constant 0 : index
    %c0_15 = arith.constant 0 : index
    %18 = vector.load %arg7[%c0_14, %c0_15] : memref<1x128xf32, #tpu.memory_space<vmem>>, vector<1x128xf32>
    %19 = arith.truncf %16 : vector<8x128xf32> to vector<8x128xbf16>
    %cst_16 = arith.constant dense<0.000000e+00> : vector<8x128xf32>
    %20 = tpu.matmul %19, %17, %cst_16 {dimension_numbers = #tpu.dot_dimension_numbers<[1], [0], [0], [1], [0, 0, 1, 1], [], []>} : vector<8x128xbf16>, vector<128x128xbf16>, vector<8x128xf32> -> vector<8x128xf32>
    %21 = vector.broadcast %18 : vector<1x128xf32> to vector<8x128xf32>
    %22 = arith.addf %20, %21 : vector<8x128xf32>
    %c0_17 = arith.constant 0 : index
    %c0_18 = arith.constant 0 : index
    %23 = vector.load %arg8[%c0_17, %c0_18] : memref<8x128xf32, #tpu.memory_space<vmem>>, vector<8x128xf32>
    tpu.vector_store %arg8[%c0_17, %c0_18], %22 {strides = array<i32>} : memref<8x128xf32, #tpu.memory_space<vmem>>, vector<8x128xf32>,
    return
  }
  func.func @transform_0(%arg0: i32) -> (i32, i32) {
    %c0_i32 = arith.constant 0 : i32
    %c0_i32_0 = arith.constant 0 : i32
    return %arg0, %c0_i32 : i32, i32
  }
  func.func @transform_1(%arg0: i32) -> (i32, i32) {
    %c0_i32 = arith.constant 0 : i32
    %c0_i32_0 = arith.constant 0 : i32
    %c0_i32_1 = arith.constant 0 : i32
    return %c0_i32, %c0_i32_0 : i32, i32
  }
  func.func @transform_2(%arg0: i32) -> (i32, i32) {
    %c0_i32 = arith.constant 0 : i32
    %c0_i32_0 = arith.constant 0 : i32
    %c0_i32_1 = arith.constant 0 : i32
    return %c0_i32, %c0_i32_0 : i32, i32
  }
  func.func @transform_3(%arg0: i32) -> (i32, i32) {
    %c0_i32 = arith.constant 0 : i32
    %c0_i32_0 = arith.constant 0 : i32
    %c0_i32_1 = arith.constant 0 : i32
    return %c0_i32, %c0_i32_0 : i32, i32
  }
  func.func @transform_4(%arg0: i32) -> (i32, i32) {
    %c0_i32 = arith.constant 0 : i32
    %c0_i32_0 = arith.constant 0 : i32
    %c0_i32_1 = arith.constant 0 : i32
    return %c0_i32, %c0_i32_0 : i32, i32
  }
  func.func @transform_5(%arg0: i32) -> (i32, i32) {
    %c0_i32 = arith.constant 0 : i32
    %c0_i32_0 = arith.constant 0 : i32
    %c0_i32_1 = arith.constant 0 : i32
    return %c0_i32, %c0_i32_0 : i32, i32
  }
  func.func @transform_6(%arg0: i32) -> (i32, i32) {
    %c0_i32 = arith.constant 0 : i32
    %c0_i32_0 = arith.constant 0 : i32
    %c0_i32_1 = arith.constant 0 : i32
    return %c0_i32, %c0_i32_0 : i32, i32
  }
  func.func @transform_7(%arg0: i32) -> (i32, i32) {
    %c0_i32 = arith.constant 0 : i32
    %c0_i32_0 = arith.constant 0 : i32
    return %arg0, %c0_i32 : i32, i32
  }
}

</mosaic_0001>

<bundles_post_ra>
// kernel: tpu_custom_call.1
= control target key start
LH: loop header
LB: loop body
LE: loop exit
PB: predicated region body
PF: predicated region fallthrough
CT: control target
= control target key end

     0   :  { %12 = vsyncpa [#allocation3], 0  ;;  %s805_s0 = inlined_call_operand.hbm [shape: f32[8,128], index: 0, kind: input, shape index: {}]   ;;  %s806_s1 = inlined_call_operand.hbm [shape: bf16[128,128], index: 1, kind: input, shape index: {}]   ;;  %s807_s2 = inlined_call_operand.vmem [shape: f32[1,128], index: 2, kind: input, shape index: {}]   ;;  %s808_s3 = inlined_call_operand.hbm [shape: bf16[128,128], index: 3, kind: input, shape index: {}]   ;;  %s809_s4 = inlined_call_operand.vmem [shape: f32[1,128], index: 4, kind: input, shape index: {}]   ;;  %s810_s5 = inlined_call_operand.hbm [shape: bf16[128,128], index: 5, kind: input, shape index: {}]   ;;  %s811_s6 = inlined_call_operand.vmem [shape: f32[1,128], index: 6, kind: input, shape index: {}]   ;;  %s812_s7 = inlined_call_operand.hbm [shape: f32[8,128], index: 7, kind: output, shape index: {}]  }
   0x1   :  { %13 = vsyncpa [#allocation6], 0 }
   0x2   :  { %14 = vsyncpa [#allocation9], 0 }
   0x3   :  { %15 = vsyncpa [#allocation4], 0  ;;  %s693_s24 = smov [#allocation5]  }
   0x4   :  { %s31_s25 = sshll.u32 %s693_s24, 4  ;;  %s32_s25 = int_to_ptr.vmem [resolvable:$true] %s31_s25 }
   0x5   :  { %s593_s26 = scalar_lea.vmem %s32_s25, 1024  ;;  %p598_p1 = scmp.lt.s32.totalorder %s32_s25, %s32_s25 }
   0x6   :  { %p594_p0 = scmp.ne.s32.totalorder %s32_s25, %s593_s26  ;;  %p599_p2 = scmp.lt.s32.totalorder %s593_s26, %s593_s26 }
   0x8   :  { %p600_p3 = por %p599_p2, %p598_p1 }
   0xa   :  { %p601_p4 = pnand %p600_p3, %p594_p0 }
   0xc   :  { %604 = shalt.err (!%p601_p4)
}
   0xd   :  { %s694_s27 = smov 64   ;;  %s695_s28 = smov 4  }
   0xe   :  { %37 = dma.hbm_to_vmem [thread:$0]  %s806_s1, 1024, %s32_s25, [#allocation6], %s694_s27, %s694_s27, %s695_s28  }
   0xf   :  { %s696_s8 = smov [#allocation2]   ;;  %s697_s10 = smov [#allocation7]  }
  0x10   :  { %s22_s9 = sshll.u32 %s696_s8, 4  ;;  %s45_s11 = sshll.u32 %s697_s10, 4  ;;  %s23_s9 = int_to_ptr.vmem [resolvable:$true] %s22_s9  ;;  %s46_s11 = int_to_ptr.vmem [resolvable:$true] %s45_s11 }
  0x11   :  { %s613_s12 = scalar_lea.vmem %s23_s9, 128  ;;  %p618_p6 = scmp.lt.s32.totalorder %s23_s9, %s23_s9 }
  0x12   :  { %p614_p5 = scmp.ne.s32.totalorder %s23_s9, %s613_s12  ;;  %p619_p7 = scmp.lt.s32.totalorder %s613_s12, %s613_s12 }
  0x14   :  { %p620_p8 = por %p619_p7, %p618_p6 }
  0x16   :  { %p621_p9 = pnand %p620_p8, %p614_p5 }
  0x18   :  { %624 = shalt.err (!%p621_p9)
}
  0x19   :  { %25 = dma.hbm_to_vmem [thread:$0]  %s805_s0, 128, %s23_s9, [#allocation3]  }
  0x1a   :  { %s633_s15 = scalar_lea.vmem %s46_s11, 1024  ;;  %p638_p11 = scmp.lt.s32.totalorder %s46_s11, %s46_s11 }
  0x1b   :  { %p634_p10 = scmp.ne.s32.totalorder %s46_s11, %s633_s15  ;;  %p639_p12 = scmp.lt.s32.totalorder %s633_s15, %s633_s15 }
  0x1d   :  { %p640_p13 = por %p639_p12, %p638_p11 }
  0x1f   :  { %p641_p0 = pnand %p640_p13, %p634_p10 }
  0x21   :  { %644 = shalt.err (!%p641_p0)
}
  0x22   :  { %51 = dma.hbm_to_vmem [thread:$0]  %s808_s3, 1024, %s46_s11, [#allocation6], %s694_s27, %s694_s27, %s695_s28  }
  0x23   :  { %s698_s17 = smov [#allocation8]  }
  0x24   :  { %s59_s18 = sshll.u32 %s698_s17, 4  ;;  %s60_s18 = int_to_ptr.vmem [resolvable:$true] %s59_s18 }
  0x25   :  { %s653_s19 = scalar_lea.vmem %s60_s18, 1024  ;;  %p658_p2 = scmp.lt.s32.totalorder %s60_s18, %s60_s18 }
  0x26   :  { %p654_p1 = scmp.ne.s32.totalorder %s60_s18, %s653_s19  ;;  %p659_p3 = scmp.lt.s32.totalorder %s653_s19, %s653_s19 }
  0x28   :  { %p660_p4 = por %p659_p3, %p658_p2 }
  0x2a   :  { %p661_p5 = pnand %p660_p4, %p654_p1 }
  0x2c   :  { %664 = shalt.err (!%p661_p5)
}
  0x2d   :  { %65 = dma.hbm_to_vmem [thread:$0]  %s810_s5, 1024, %s60_s18, [#allocation9], %s694_s27, %s694_s27, %s695_s28  }
  0x2e   :  { %685 = dma.done.wait [#allocation3], 128  }
  0x2f   :  { %686 = vsyncadd [#allocation3], 4294967168 }
  0x30   :  { %687 = dma.done.wait [#allocation6], 2048  }
  0x31   :  { %688 = vsyncadd [#allocation6], 4294965248 }
  0x32   :  { %689 = dma.done.wait [#allocation9], 1024  }
  0x33   :  { %690 = vsyncadd [#allocation9], 4294966272  ;;  %v699_v0 = vmov 0.0   ;;  %vm700_vm0 = vmmov 0   ;;  %v561_v1 = vld [vmem:[#allocation5 + $0x38] sm:$0xff]   ;;  %v562_v2 = vld [vmem:[#allocation5 + $0x30] sm:$0xff]  }
  0x34   :  { %492 = vmatprep.subr.bf16.mxu0 %v699_v0  ;;  %508 = vmatprep.mubr.msk.bf16.mxu0 %vm700_vm0, %v699_v0  ;;  %v563_v3 = vld [vmem:[#allocation5 + $0x28] sm:$0xff]   ;;  %v569_v4 = vld [vmem:[#allocation7 + $0x38] sm:$0xff]   ;;  %v564_v5 = vld [vmem:[#allocation5 + $0x20] sm:$0xff]   ;;  %s701_s24 = smov [#allocation10]  }
  0x35   :  { %512 = vmatprep.subr.bf16.mxu1 %v699_v0  ;;  %528 = vmatprep.mubr.msk.bf16.mxu1 %vm700_vm0, %v699_v0  ;;  %v570_v6 = vld [vmem:[#allocation7 + $0x30] sm:$0xff]   ;;  %v565_v7 = vld [vmem:[#allocation5 + $0x18] sm:$0xff]   ;;  %v571_v8 = vld [vmem:[#allocation7 + $0x28] sm:$0xff]   ;;  %s427_s25 = sshll.u32 %s701_s24, 4  ;;  %s428_s25 = int_to_ptr.vmem [resolvable:$true] %s427_s25 }
  0x36   :  { %493 = vmatpush3.bf16.msra.mxu0 %v561_v1  ;;  %513 = vmatpush3.bf16.msra.mxu1 %v569_v4  ;;  %v566_v9 = vld [vmem:[#allocation5 + $0x10] sm:$0xff]   ;;  %v572_v10 = vld [vmem:[#allocation7 + $0x20] sm:$0xff]   ;;  %v567_v11 = vld [vmem:[#allocation5 + $0x8] sm:$0xff]   ;;  %p670_p7 = scmp.lt.s32.totalorder %s428_s25, %s428_s25 }
  0x37   :  { %494 = vmatprep.subr.bf16.mxu0 %v699_v0  ;;  %514 = vmatprep.subr.bf16.mxu1 %v699_v0  ;;  %v573_v12 = vld [vmem:[#allocation7 + $0x18] sm:$0xff]   ;;  %v568_v13 = vld [vmem:[#allocation5] sm:$0xff]   ;;  %v574_v15 = vld [vmem:[#allocation7 + $0x10] sm:$0xff]  }
  0x38   :  { %v81_v14 = vld [vmem:[#allocation2] sm:$0xff]  ;;  %v575_v17 = vld [vmem:[#allocation7 + $0x8] sm:$0xff]   ;;  %v576_v18 = vld [vmem:[#allocation7] sm:$0xff]  }
  0x39   :  { %v99_v16 = vpack.c.bf16 %v81_v14, %v81_v14  ;;  %v577_v19 = vld [vmem:[#allocation8 + $0x38] sm:$0xff]   ;;  %v578_v20 = vld [vmem:[#allocation8 + $0x30] sm:$0xff]   ;;  %v579_v21 = vld [vmem:[#allocation8 + $0x28] sm:$0xff]  }
  0x3a   :  { %495 = vmatpush3.bf16.msra.mxu0 %v562_v2  ;;  %515 = vmatpush3.bf16.msra.mxu1 %v570_v6  ;;  %v580_v22 = vld [vmem:[#allocation8 + $0x20] sm:$0xff]   ;;  %v581_v23 = vld [vmem:[#allocation8 + $0x18] sm:$0xff]   ;;  %v582_v24 = vld [vmem:[#allocation8 + $0x10] sm:$0xff]  }
  0x3b   :  { %496 = vmatprep.subr.bf16.mxu0 %v699_v0  ;;  %516 = vmatprep.subr.bf16.mxu1 %v699_v0  ;;  %v438_v25 = vld [vmem:[%s807_s2] ss:$0 sm:$0xff]  ;;  %v583_v33 = vld [vmem:[#allocation8 + $0x8] sm:$0xff]   ;;  %v584_v34 = vld [vmem:[#allocation8] sm:$0xff]  }
  0x3c   :  { %v447_v35 = vld [vmem:[%s809_s4] ss:$0 sm:$0xff]  ;;  %s665_s4 = scalar_lea.vmem %s428_s25, 128 }
  0x3d   :  { %v456_v43 = vld [vmem:[%s811_s6] ss:$0 sm:$0xff]  ;;  %p666_p6 = scmp.ne.s32.totalorder %s428_s25, %s665_s4  ;;  %p671_p8 = scmp.lt.s32.totalorder %s665_s4, %s665_s4 }
  0x3e   :  { %497 = vmatpush3.bf16.msra.mxu0 %v563_v3  ;;  %517 = vmatpush3.bf16.msra.mxu1 %v571_v8 }
  0x3f   :  { %498 = vmatprep.subr.bf16.mxu0 %v699_v0  ;;  %518 = vmatprep.subr.bf16.mxu1 %v699_v0  ;;  %p672_p9 = por %p671_p8, %p670_p7 }
  0x41   :  { %p673_p10 = pnand %p672_p9, %p666_p6 }
  0x42   :  { %499 = vmatpush3.bf16.msra.mxu0 %v564_v5  ;;  %519 = vmatpush3.bf16.msra.mxu1 %v572_v10 }
  0x43   :  { %500 = vmatprep.subr.bf16.mxu0 %v699_v0  ;;  %520 = vmatprep.subr.bf16.mxu1 %v699_v0 }
  0x46   :  { %501 = vmatpush3.bf16.msra.mxu0 %v565_v7  ;;  %521 = vmatpush3.bf16.msra.mxu1 %v573_v12 }
  0x47   :  { %502 = vmatprep.subr.bf16.mxu0 %v699_v0  ;;  %522 = vmatprep.subr.bf16.mxu1 %v699_v0 }
  0x4a   :  { %503 = vmatpush3.bf16.msra.mxu0 %v566_v9  ;;  %523 = vmatpush3.bf16.msra.mxu1 %v574_v15 }
  0x4b   :  { %504 = vmatprep.subr.bf16.mxu0 %v699_v0  ;;  %524 = vmatprep.subr.bf16.mxu1 %v699_v0 }
  0x4e   :  { %505 = vmatpush3.bf16.msra.mxu0 %v567_v11  ;;  %525 = vmatpush3.bf16.msra.mxu1 %v575_v17 }
  0x4f   :  { %506 = vmatprep.subr.bf16.mxu0 %v699_v0  ;;  %526 = vmatprep.subr.bf16.mxu1 %v699_v0 }
  0x52   :  { %507 = vmatpush3.bf16.msra.mxu0 %v568_v13  ;;  %527 = vmatpush3.bf16.msra.mxu1 %v576_v18 }
  0x53   :  { %532 = vmatprep.subr.bf16.mxu0 %v699_v0 }
  0x55   :  { %509 = vmatmul.mubr.bf16.vlgmr.msra.gmra.mxu0 %v99_v16 }
  0x56   :  { %548 = vmatprep.mubr.msk.bf16.mxu0 %vm700_vm0, %v699_v0  ;;  %533 = vmatpush3.bf16.msra.mxu0 %v577_v19 }
  0x57   :  { %534 = vmatprep.subr.bf16.mxu0 %v699_v0 }
  0x5a   :  { %535 = vmatpush3.bf16.msra.mxu0 %v578_v20 }
  0x5b   :  { %536 = vmatprep.subr.bf16.mxu0 %v699_v0 }
  0x5e   :  { %537 = vmatpush3.bf16.msra.mxu0 %v579_v21 }
  0x5f   :  { %538 = vmatprep.subr.bf16.mxu0 %v699_v0 }
  0x62   :  { %539 = vmatpush3.bf16.msra.mxu0 %v580_v22 }
  0x63   :  { %540 = vmatprep.subr.bf16.mxu0 %v699_v0 }
  0x66   :  { %541 = vmatpush3.bf16.msra.mxu0 %v581_v23 }
  0x67   :  { %542 = vmatprep.subr.bf16.mxu0 %v699_v0 }
  0x6a   :  { %543 = vmatpush3.bf16.msra.mxu0 %v582_v24 }
  0x6b   :  { %544 = vmatprep.subr.bf16.mxu0 %v699_v0 }
  0x6e   :  { %545 = vmatpush3.bf16.msra.mxu0 %v583_v33 }
  0x6f   :  { %546 = vmatprep.subr.bf16.mxu0 %v699_v0 }
  0x72   :  { %547 = vmatpush3.bf16.msra.mxu0 %v584_v34 }
 0x115   :  { %v188_v26 = vpop.f32.mrf.mxu0 }
 0x116   :  { %v189_v27 = vadd.f32 %v438_v25, %v188_v26 }
 0x117   :  { %v510_v28 = vpop.f32.mrf.mxu0 }
 0x118   :  { %v194_v29 = vmax.f32 %v189_v27, 0.0 }
 0x119   :  { %v191_v30 = vpop.f32.mrf.mxu0 }
 0x11a   :  { %v212_v31 = vpack.c.bf16 %v194_v29, %v194_v29 }
 0x11b   :  { %v511_v32 = vpop.f32.mrf.mxu0 }
 0x11c   :  { %529 = vmatmul.mubr.bf16.vlgmr.msra.gmra.mxu1 %v212_v31 }
 0x1dc   :  { %v301_v36 = vpop.f32.mrf.mxu1 }
 0x1dd   :  { %v302_v37 = vadd.f32 %v447_v35, %v301_v36 }
 0x1de   :  { %v530_v38 = vpop.f32.mrf.mxu1 }
 0x1df   :  { %v307_v39 = vmax.f32 %v302_v37, 0.0 }
 0x1e0   :  { %v304_v40 = vpop.f32.mrf.mxu1 }
 0x1e1   :  { %v325_v41 = vpack.c.bf16 %v307_v39, %v307_v39 }
 0x1e2   :  { %v531_v42 = vpop.f32.mrf.mxu1 }
 0x1e3   :  { %549 = vmatmul.mubr.bf16.vlgmr.msra.gmra.mxu0 %v325_v41 }
 0x2a3   :  { %v414_v44 = vpop.f32.mrf.mxu0 }
 0x2a4   :  { %v415_v45 = vadd.f32 %v456_v43, %v414_v44 }
 0x2a5   :  { %v550_v46 = vpop.f32.mrf.mxu0 }
 0x2a6   :  { %420 = vst [vmem:[#allocation10] sm:$0xff] %v415_v45 }
 0x2a7   :  { %v417_v47 = vpop.f32.mrf.mxu0 }
 0x2a8   :  { %676 = shalt.err (!%p673_p10)
}
 0x2a9   :  { %430 = dma.vmem_to_hbm [thread:$0]  %s428_s25, 128, %s812_s7, [#allocation4]   ;;  %v551_v48 = vpop.f32.mrf.mxu0 }
 0x2aa   :  { %691 = dma.done.wait [#allocation4], 128  }
 0x2ab   :  { %692 = vsyncadd [#allocation4], 4294967168 }
 0x2ac   :  { %434 = vsyncpa [#allocation3], 1 }
 0x2ad   :  { %435 = vsyncpa [#allocation6], 1 }
 0x2ae   :  { %436 = vsyncpa [#allocation9], 1 }
 0x2af   :  { %437 = vsyncpa [#allocation4], 1 }

// kernel: tpu_custom_call.1
= control target key start
LH: loop header
LB: loop body
LE: loop exit
PB: predicated region body
PF: predicated region fallthrough
CT: control target
= control target key end

     0   :  { %12 = vsyncpa [#allocation3], 0  ;;  %s805_s0 = inlined_call_operand.hbm [shape: f32[8,128], index: 0, kind: input, shape index: {}]   ;;  %s806_s1 = inlined_call_operand.hbm [shape: bf16[128,128], index: 1, kind: input, shape index: {}]   ;;  %s807_s2 = inlined_call_operand.vmem [shape: f32[1,128], index: 2, kind: input, shape index: {}]   ;;  %s808_s3 = inlined_call_operand.hbm [shape: bf16[128,128], index: 3, kind: input, shape index: {}]   ;;  %s809_s4 = inlined_call_operand.vmem [shape: f32[1,128], index: 4, kind: input, shape index: {}]   ;;  %s810_s5 = inlined_call_operand.hbm [shape: bf16[128,128], index: 5, kind: input, shape index: {}]   ;;  %s811_s6 = inlined_call_operand.vmem [shape: f32[1,128], index: 6, kind: input, shape index: {}]   ;;  %s812_s7 = inlined_call_operand.hbm [shape: f32[8,128], index: 7, kind: output, shape index: {}]  }
   0x1   :  { %13 = vsyncpa [#allocation6], 0 }
   0x2   :  { %14 = vsyncpa [#allocation9], 0 }
   0x3   :  { %15 = vsyncpa [#allocation4], 0  ;;  %s693_s24 = smov [#allocation5]  }
   0x4   :  { %s31_s25 = sshll.u32 %s693_s24, 4  ;;  %s32_s25 = int_to_ptr.vmem [resolvable:$true] %s31_s25 }
   0x5   :  { %s593_s26 = scalar_lea.vmem %s32_s25, 1024  ;;  %p598_p1 = scmp.lt.s32.totalorder %s32_s25, %s32_s25 }
   0x6   :  { %p594_p0 = scmp.ne.s32.totalorder %s32_s25, %s593_s26  ;;  %p599_p2 = scmp.lt.s32.totalorder %s593_s26, %s593_s26 }
   0x8   :  { %p600_p3 = por %p599_p2, %p598_p1 }
   0xa   :  { %p601_p4 = pnand %p600_p3, %p594_p0 }
   0xc   :  { %604 = shalt.err (!%p601_p4)
}
   0xd   :  { %s694_s27 = smov 64   ;;  %s695_s28 = smov 4  }
   0xe   :  { %37 = dma.hbm_to_vmem [thread:$0]  %s806_s1, 1024, %s32_s25, [#allocation6], %s694_s27, %s694_s27, %s695_s28  }
   0xf   :  { %s696_s8 = smov [#allocation2]   ;;  %s697_s10 = smov [#allocation7]  }
  0x10   :  { %s22_s9 = sshll.u32 %s696_s8, 4  ;;  %s45_s11 = sshll.u32 %s697_s10, 4  ;;  %s23_s9 = int_to_ptr.vmem [resolvable:$true] %s22_s9  ;;  %s46_s11 = int_to_ptr.vmem [resolvable:$true] %s45_s11 }
  0x11   :  { %s613_s12 = scalar_lea.vmem %s23_s9, 128  ;;  %p618_p6 = scmp.lt.s32.totalorder %s23_s9, %s23_s9 }
  0x12   :  { %p614_p5 = scmp.ne.s32.totalorder %s23_s9, %s613_s12  ;;  %p619_p7 = scmp.lt.s32.totalorder %s613_s12, %s613_s12 }
  0x14   :  { %p620_p8 = por %p619_p7, %p618_p6 }
  0x16   :  { %p621_p9 = pnand %p620_p8, %p614_p5 }
  0x18   :  { %624 = shalt.err (!%p621_p9)
}
  0x19   :  { %25 = dma.hbm_to_vmem [thread:$0]  %s805_s0, 128, %s23_s9, [#allocation3]  }
  0x1a   :  { %s633_s15 = scalar_lea.vmem %s46_s11, 1024  ;;  %p638_p11 = scmp.lt.s32.totalorder %s46_s11, %s46_s11 }
  0x1b   :  { %p634_p10 = scmp.ne.s32.totalorder %s46_s11, %s633_s15  ;;  %p639_p12 = scmp.lt.s32.totalorder %s633_s15, %s633_s15 }
  0x1d   :  { %p640_p13 = por %p639_p12, %p638_p11 }
  0x1f   :  { %p641_p0 = pnand %p640_p13, %p634_p10 }
  0x21   :  { %644 = shalt.err (!%p641_p0)
}
  0x22   :  { %51 = dma.hbm_to_vmem [thread:$0]  %s808_s3, 1024, %s46_s11, [#allocation6], %s694_s27, %s694_s27, %s695_s28  }
  0x23   :  { %s698_s17 = smov [#allocation8]  }
  0x24   :  { %s59_s18 = sshll.u32 %s698_s17, 4  ;;  %s60_s18 = int_to_ptr.vmem [resolvable:$true] %s59_s18 }
  0x25   :  { %s653_s19 = scalar_lea.vmem %s60_s18, 1024  ;;  %p658_p2 = scmp.lt.s32.totalorder %s60_s18, %s60_s18 }
  0x26   :  { %p654_p1 = scmp.ne.s32.totalorder %s60_s18, %s653_s19  ;;  %p659_p3 = scmp.lt.s32.totalorder %s653_s19, %s653_s19 }
  0x28   :  { %p660_p4 = por %p659_p3, %p658_p2 }
  0x2a   :  { %p661_p5 = pnand %p660_p4, %p654_p1 }
  0x2c   :  { %664 = shalt.err (!%p661_p5)
}
  0x2d   :  { %65 = dma.hbm_to_vmem [thread:$0]  %s810_s5, 1024, %s60_s18, [#allocation9], %s694_s27, %s694_s27, %s695_s28  }
  0x2e   :  { %685 = dma.done.wait [#allocation3], 128  }
  0x2f   :  { %686 = vsyncadd [#allocation3], 4294967168 }
  0x30   :  { %687 = dma.done.wait [#allocation6], 2048  }
  0x31   :  { %688 = vsyncadd [#allocation6], 4294965248 }
  0x32   :  { %689 = dma.done.wait [#allocation9], 1024  }
  0x33   :  { %690 = vsyncadd [#allocation9], 4294966272  ;;  %v699_v0 = vmov 0.0   ;;  %vm700_vm0 = vmmov 0   ;;  %v561_v1 = vld [vmem:[#allocation5 + $0x38] sm:$0xff]   ;;  %v562_v2 = vld [vmem:[#allocation5 + $0x30] sm:$0xff]  }
  0x34   :  { %492 = vmatprep.subr.bf16.mxu0 %v699_v0  ;;  %508 = vmatprep.mubr.msk.bf16.mxu0 %vm700_vm0, %v699_v0  ;;  %v563_v3 = vld [vmem:[#allocation5 + $0x28] sm:$0xff]   ;;  %v569_v4 = vld [vmem:[#allocation7 + $0x38] sm:$0xff]   ;;  %v564_v5 = vld [vmem:[#allocation5 + $0x20] sm:$0xff]   ;;  %s701_s24 = smov [#allocation10]  }
  0x35   :  { %512 = vmatprep.subr.bf16.mxu1 %v699_v0  ;;  %528 = vmatprep.mubr.msk.bf16.mxu1 %vm700_vm0, %v699_v0  ;;  %v570_v6 = vld [vmem:[#allocation7 + $0x30] sm:$0xff]   ;;  %v565_v7 = vld [vmem:[#allocation5 + $0x18] sm:$0xff]   ;;  %v571_v8 = vld [vmem:[#allocation7 + $0x28] sm:$0xff]   ;;  %s427_s25 = sshll.u32 %s701_s24, 4  ;;  %s428_s25 = int_to_ptr.vmem [resolvable:$true] %s427_s25 }
  0x36   :  { %493 = vmatpush3.bf16.msra.mxu0 %v561_v1  ;;  %513 = vmatpush3.bf16.msra.mxu1 %v569_v4  ;;  %v566_v9 = vld [vmem:[#allocation5 + $0x10] sm:$0xff]   ;;  %v572_v10 = vld [vmem:[#allocation7 + $0x20] sm:$0xff]   ;;  %v567_v11 = vld [vmem:[#allocation5 + $0x8] sm:$0xff]   ;;  %p670_p7 = scmp.lt.s32.totalorder %s428_s25, %s428_s25 }
  0x37   :  { %494 = vmatprep.subr.bf16.mxu0 %v699_v0  ;;  %514 = vmatprep.subr.bf16.mxu1 %v699_v0  ;;  %v573_v12 = vld [vmem:[#allocation7 + $0x18] sm:$0xff]   ;;  %v568_v13 = vld [vmem:[#allocation5] sm:$0xff]   ;;  %v574_v15 = vld [vmem:[#allocation7 + $0x10] sm:$0xff]  }
  0x38   :  { %v81_v14 = vld [vmem:[#allocation2] sm:$0xff]  ;;  %v575_v17 = vld [vmem:[#allocation7 + $0x8] sm:$0xff]   ;;  %v576_v18 = vld [vmem:[#allocation7] sm:$0xff]  }
  0x39   :  { %v99_v16 = vpack.c.bf16 %v81_v14, %v81_v14  ;;  %v577_v19 = vld [vmem:[#allocation8 + $0x38] sm:$0xff]   ;;  %v578_v20 = vld [vmem:[#allocation8 + $0x30] sm:$0xff]   ;;  %v579_v21 = vld [vmem:[#allocation8 + $0x28] sm:$0xff]  }
  0x3a   :  { %495 = vmatpush3.bf16.msra.mxu0 %v562_v2  ;;  %515 = vmatpush3.bf16.msra.mxu1 %v570_v6  ;;  %v580_v22 = vld [vmem:[#allocation8 + $0x20] sm:$0xff]   ;;  %v581_v23 = vld [vmem:[#allocation8 + $0x18] sm:$0xff]   ;;  %v582_v24 = vld [vmem:[#allocation8 + $0x10] sm:$0xff]  }
  0x3b   :  { %496 = vmatprep.subr.bf16.mxu0 %v699_v0  ;;  %516 = vmatprep.subr.bf16.mxu1 %v699_v0  ;;  %v438_v25 = vld [vmem:[%s807_s2] ss:$0 sm:$0xff]  ;;  %v583_v33 = vld [vmem:[#allocation8 + $0x8] sm:$0xff]   ;;  %v584_v34 = vld [vmem:[#allocation8] sm:$0xff]  }
  0x3c   :  { %v447_v35 = vld [vmem:[%s809_s4] ss:$0 sm:$0xff]  ;;  %s665_s4 = scalar_lea.vmem %s428_s25, 128 }
  0x3d   :  { %v456_v43 = vld [vmem:[%s811_s6] ss:$0 sm:$0xff]  ;;  %p666_p6 = scmp.ne.s32.totalorder %s428_s25, %s665_s4  ;;  %p671_p8 = scmp.lt.s32.totalorder %s665_s4, %s665_s4 }
  0x3e   :  { %497 = vmatpush3.bf16.msra.mxu0 %v563_v3  ;;  %517 = vmatpush3.bf16.msra.mxu1 %v571_v8 }
  0x3f   :  { %498 = vmatprep.subr.bf16.mxu0 %v699_v0  ;;  %518 = vmatprep.subr.bf16.mxu1 %v699_v0  ;;  %p672_p9 = por %p671_p8, %p670_p7 }
  0x41   :  { %p673_p10 = pnand %p672_p9, %p666_p6 }
  0x42   :  { %499 = vmatpush3.bf16.msra.mxu0 %v564_v5  ;;  %519 = vmatpush3.bf16.msra.mxu1 %v572_v10 }
  0x43   :  { %500 = vmatprep.subr.bf16.mxu0 %v699_v0  ;;  %520 = vmatprep.subr.bf16.mxu1 %v699_v0 }
  0x46   :  { %501 = vmatpush3.bf16.msra.mxu0 %v565_v7  ;;  %521 = vmatpush3.bf16.msra.mxu1 %v573_v12 }
  0x47   :  { %502 = vmatprep.subr.bf16.mxu0 %v699_v0  ;;  %522 = vmatprep.subr.bf16.mxu1 %v699_v0 }
  0x4a   :  { %503 = vmatpush3.bf16.msra.mxu0 %v566_v9  ;;  %523 = vmatpush3.bf16.msra.mxu1 %v574_v15 }
  0x4b   :  { %504 = vmatprep.subr.bf16.mxu0 %v699_v0  ;;  %524 = vmatprep.subr.bf16.mxu1 %v699_v0 }
  0x4e   :  { %505 = vmatpush3.bf16.msra.mxu0 %v567_v11  ;;  %525 = vmatpush3.bf16.msra.mxu1 %v575_v17 }
  0x4f   :  { %506 = vmatprep.subr.bf16.mxu0 %v699_v0  ;;  %526 = vmatprep.subr.bf16.mxu1 %v699_v0 }
  0x52   :  { %507 = vmatpush3.bf16.msra.mxu0 %v568_v13  ;;  %527 = vmatpush3.bf16.msra.mxu1 %v576_v18 }
  0x53   :  { %532 = vmatprep.subr.bf16.mxu0 %v699_v0 }
  0x55   :  { %509 = vmatmul.mubr.bf16.vlgmr.msra.gmra.mxu0 %v99_v16 }
  0x56   :  { %548 = vmatprep.mubr.msk.bf16.mxu0 %vm700_vm0, %v699_v0  ;;  %533 = vmatpush3.bf16.msra.mxu0 %v577_v19 }
  0x57   :  { %534 = vmatprep.subr.bf16.mxu0 %v699_v0 }
  0x5a   :  { %535 = vmatpush3.bf16.msra.mxu0 %v578_v20 }
  0x5b   :  { %536 = vmatprep.subr.bf16.mxu0 %v699_v0 }
  0x5e   :  { %537 = vmatpush3.bf16.msra.mxu0 %v579_v21 }
  0x5f   :  { %538 = vmatprep.subr.bf16.mxu0 %v699_v0 }
  0x62   :  { %539 = vmatpush3.bf16.msra.mxu0 %v580_v22 }
  0x63   :  { %540 = vmatprep.subr.bf16.mxu0 %v699_v0 }
  0x66   :  { %541 = vmatpush3.bf16.msra.mxu0 %v581_v23 }
  0x67   :  { %542 = vmatprep.subr.bf16.mxu0 %v699_v0 }
  0x6a   :  { %543 = vmatpush3.bf16.msra.mxu0 %v582_v24 }
  0x6b   :  { %544 = vmatprep.subr.bf16.mxu0 %v699_v0 }
  0x6e   :  { %545 = vmatpush3.bf16.msra.mxu0 %v583_v33 }
  0x6f   :  { %546 = vmatprep.subr.bf16.mxu0 %v699_v0 }
  0x72   :  { %547 = vmatpush3.bf16.msra.mxu0 %v584_v34 }
 0x115   :  { %v188_v26 = vpop.f32.mrf.mxu0 }
 0x116   :  { %v189_v27 = vadd.f32 %v438_v25, %v188_v26 }
 0x117   :  { %v510_v28 = vpop.f32.mrf.mxu0 }
 0x118   :  { %v194_v29 = vmax.f32 %v189_v27, 0.0 }
 0x119   :  { %v191_v30 = vpop.f32.mrf.mxu0 }
 0x11a   :  { %v212_v31 = vpack.c.bf16 %v194_v29, %v194_v29 }
 0x11b   :  { %v511_v32 = vpop.f32.mrf.mxu0 }
 0x11c   :  { %529 = vmatmul.mubr.bf16.vlgmr.msra.gmra.mxu1 %v212_v31 }
 0x1dc   :  { %v301_v36 = vpop.f32.mrf.mxu1 }
 0x1dd   :  { %v302_v37 = vadd.f32 %v447_v35, %v301_v36 }
 0x1de   :  { %v530_v38 = vpop.f32.mrf.mxu1 }
 0x1df   :  { %v307_v39 = vmax.f32 %v302_v37, 0.0 }
 0x1e0   :  { %v304_v40 = vpop.f32.mrf.mxu1 }
 0x1e1   :  { %v325_v41 = vpack.c.bf16 %v307_v39, %v307_v39 }
 0x1e2   :  { %v531_v42 = vpop.f32.mrf.mxu1 }
 0x1e3   :  { %549 = vmatmul.mubr.bf16.vlgmr.msra.gmra.mxu0 %v325_v41 }
 0x2a3   :  { %v414_v44 = vpop.f32.mrf.mxu0 }
 0x2a4   :  { %v415_v45 = vadd.f32 %v456_v43, %v414_v44 }
 0x2a5   :  { %v550_v46 = vpop.f32.mrf.mxu0 }
 0x2a6   :  { %420 = vst [vmem:[#allocation10] sm:$0xff] %v415_v45 }
 0x2a7   :  { %v417_v47 = vpop.f32.mrf.mxu0 }
 0x2a8   :  { %676 = shalt.err (!%p673_p10)
}
 0x2a9   :  { %430 = dma.vmem_to_hbm [thread:$0]  %s428_s25, 128, %s812_s7, [#allocation4]   ;;  %v551_v48 = vpop.f32.mrf.mxu0 }
 0x2aa   :  { %691 = dma.done.wait [#allocation4], 128  }
 0x2ab   :  { %692 = vsyncadd [#allocation4], 4294967168 }
 0x2ac   :  { %434 = vsyncpa [#allocation3], 1 }
 0x2ad   :  { %435 = vsyncpa [#allocation6], 1 }
 0x2ae   :  { %436 = vsyncpa [#allocation9], 1 }
 0x2af   :  { %437 = vsyncpa [#allocation4], 1 }

</bundles_post_ra>
